<compile_context>
chip_gen: v7x
topology: tpu7x:2x2x1
jax: 0.10.0
libtpu: 0.0.40
codegen_flags: <defaults>
</compile_context>

<pallas_src>
import functools

import jax
import jax.numpy as jnp
from jax.experimental import pallas as pl
from jax.experimental.pallas import tpu as pltpu


def _round_up(n, m):
    return ((n + m - 1) // m) * m


def _choose_tile(batch, block_b):
    """Pick a lane-dense batch tile TB (multiple of 128) and padded batch."""
    block_b = max(128, _round_up(int(block_b), 128))   # enforce 128-lane multiple
    b128 = _round_up(batch, 128)
    if b128 <= 128:
        tb = 128                                       # single tile, G = 1
    else:
        # Guarantee G >= 2 so ("parallel",) can shard across both v7x cores,
        # while capping the tile at block_b for very large batches.
        half = _round_up((b128 + 1) // 2, 128)
        tb = min(block_b, half)
    b_pad = _round_up(batch, tb)
    return tb, b_pad, b_pad // tb


def mlp_kernel(x_ref, w1_ref, b1_ref, w2_ref, b2_ref, w3_ref, b3_ref,
               w4_ref, b4_ref, out_ref):
    """Fused relu(fc1)->relu(fc2)->relu(fc3)->fc4 on one (TB, F) batch tile.

    The first matmul contracts x's lane (feature) axis, so batch lives on the
    lane axis of every intermediate; all matmuls have a lane-dense N dim and
    the (1, TB) output stores with full-width vector stores.
    """
    # fc1 in f32: w1 @ x^T via NT dot_general (no wrapper transpose/cast).
    h = jax.lax.dot_general(
        w1_ref[...], x_ref[...],
        dimension_numbers=(((1,), (1,)), ((), ())),
        preferred_element_type=jnp.float32)                 # (H1, TB) f32
    h = jnp.maximum(h + b1_ref[...], 0.0).astype(jnp.bfloat16)
    # dropout: identity at inference (eval mode)

    # fc2 / fc3: bf16 operands, f32 MXU accumulation.
    h = jnp.dot(w2_ref[...], h, preferred_element_type=jnp.float32)
    h = jnp.maximum(h + b2_ref[...], 0.0).astype(jnp.bfloat16)
    # dropout: identity at inference (eval mode)

    h = jnp.dot(w3_ref[...], h, preferred_element_type=jnp.float32)
    h = jnp.maximum(h + b3_ref[...], 0.0)                   # (H3, TB) f32

    # fc4 (out_features = 1) in f32 on the VPU/XLU: broadcast-FMA over the
    # (H3, TB) tile + sublane reduce, instead of an M=1 MXU matmul.
    y = jnp.sum(h * w4_ref[...], axis=0, keepdims=True) + b4_ref[...]  # (1, TB)

    # Output block is (1, 1, TB): lane-dense stores (sublane dim 1 is a known
    # low-priority inefficiency; only ~4 B/row written).
    out_ref[...] = y[None].astype(out_ref.dtype)


@functools.partial(jax.jit, static_argnames=("block_b",))
def concrete_strength_forward(x, params, *, block_b=8192):
    """x: [B, input_size] float32; params in PyTorch layout.

    params[f"w{i}"]: [out_features, in_features], params[f"b{i}"]: [out_features].
    Returns [B, 1] float32.
    """
    B, F = x.shape
    TB, B_pad, G = _choose_tile(B, block_b)

    # Only a zero-pad on the batch axis when needed (no transpose/cast pre-pass).
    if B_pad != B:
        x = jnp.pad(x, ((0, B_pad - B), (0, 0)))

    # Weights/biases (tiny): fc1 and fc4 in f32, fc2/fc3 in bf16 for the MXU.
    w1 = params["w1"].astype(jnp.float32)                    # (H1, F)
    w2 = params["w2"].astype(jnp.bfloat16)                   # (H2, H1)
    w3 = params["w3"].astype(jnp.bfloat16)                   # (H3, H2)
    w4 = params["w4"].reshape(-1, 1).astype(jnp.float32)     # (H3, 1) column
    b1 = params["b1"].reshape(-1, 1).astype(jnp.float32)
    b2 = params["b2"].reshape(-1, 1).astype(jnp.float32)
    b3 = params["b3"].reshape(-1, 1).astype(jnp.float32)
    b4 = params["b4"].reshape(1, 1).astype(jnp.float32)

    # Weights/biases use a constant index_map so they stay resident in VMEM
    # across all grid steps.
    resident = lambda a: pl.BlockSpec(a.shape, lambda i: (0, 0))

    dims = [F, int(w1.shape[0]), int(w2.shape[0]), int(w3.shape[0]), 1]
    flops = 2 * B_pad * sum(dims[i] * dims[i + 1] for i in range(4))
    bytes_accessed = (B_pad * F * 4                              # x read
                      + int(w1.size) * 4 + int(w2.size) * 2 + int(w3.size) * 2
                      + int(w4.size) * 4
                      + sum(int(b.size) * 4 for b in (b1, b2, b3, b4))
                      + B_pad * 4)                               # output write

    out = pl.pallas_call(
        mlp_kernel,
        out_shape=jax.ShapeDtypeStruct((G, 1, TB), jnp.float32),
        grid=(G,),
        in_specs=[pl.BlockSpec((TB, F), lambda i: (i, 0)),       # x batch tile
                  resident(w1), resident(b1),
                  resident(w2), resident(b2),
                  resident(w3), resident(b3),
                  resident(w4), resident(b4)],
        out_specs=pl.BlockSpec((1, 1, TB), lambda i: (i, 0, 0)),
        compiler_params=pltpu.CompilerParams(
            dimension_semantics=("parallel",),
            # ~6-8 MB live at TB=8192; raise the scoped limit well clear of the
            # v5e 16 MiB default while staying far under v7x's 64 MiB physical.
            vmem_limit_bytes=32 * 1024 * 1024),
        cost_estimate=pl.CostEstimate(
            flops=flops, transcendentals=0, bytes_accessed=bytes_accessed),
    )(x, w1, b1, w2, b2, w3, b3, w4, b4)

    # (G, 1, TB) -> (B_pad,) in batch order -> trim padding -> (B, 1)
    return out.reshape(B_pad)[:B].reshape(B, 1)


def init_params(key, input_size=8, hidden_size=64):
    """Deterministic init mirroring nn.Linear: w[i] is [out, in], b[i] is [out]."""
    dims = [input_size, hidden_size, hidden_size // 2, hidden_size // 4, 1]
    params = {}
    for i in range(4):
        fan_in, fan_out = dims[i], dims[i + 1]
        key, kw, kb = jax.random.split(key, 3)
        bound = 1.0 / (fan_in ** 0.5)
        params[f"w{i+1}"] = jax.random.uniform(
            kw, (fan_out, fan_in), jnp.float32, -bound, bound)
        params[f"b{i+1}"] = jax.random.uniform(
            kb, (fan_out,), jnp.float32, -bound, bound)
    return params


def reference_forward(x, params):
    """Pure-JAX reference with matching dtype semantics (fc1/fc4 f32, fc2/fc3 bf16)."""
    h = jnp.maximum(jnp.dot(x, params["w1"].T) + params["b1"], 0.0)        # f32
    h = h.astype(jnp.bfloat16)
    h = jnp.dot(h, params["w2"].T.astype(jnp.bfloat16),
                preferred_element_type=jnp.float32) + params["b2"]
    h = jnp.maximum(h, 0.0).astype(jnp.bfloat16)
    h = jnp.dot(h, params["w3"].T.astype(jnp.bfloat16),
                preferred_element_type=jnp.float32) + params["b3"]
    h = jnp.maximum(h, 0.0)                                                # f32
    return jnp.dot(h, params["w4"].T) + params["b4"]                       # f32


if __name__ == "__main__":
    key = jax.random.PRNGKey(0)
    key, kx = jax.random.split(key)

    batch, input_size, hidden_size = 16, 8, 64
    x = jax.random.normal(kx, (batch, input_size), jnp.float32)
    params = init_params(key, input_size=input_size, hidden_size=hidden_size)

    out = jax.block_until_ready(concrete_strength_forward(x, params))
    ref = reference_forward(x, params)
    assert out.shape == (batch, 1), out.shape
    assert jnp.allclose(out, ref, atol=1e-2, rtol=1e-2), (
        f"max abs err {jnp.max(jnp.abs(out - ref))}")

    # Multi-tile path: grid > 1 (exercises the G>=2 / megacore split) with a
    # partially-padded last batch tile.
    key, kx2 = jax.random.split(key)
    b2 = 700
    x2 = jax.random.normal(kx2, (b2, input_size), jnp.float32)
    out2 = jax.block_until_ready(
        concrete_strength_forward(x2, params, block_b=256))
    ref2 = reference_forward(x2, params)
    assert out2.shape == (b2, 1), out2.shape
    assert jnp.allclose(out2, ref2, atol=1e-2, rtol=1e-2), (
        f"max abs err {jnp.max(jnp.abs(out2 - ref2))}")

    # Default (large) tile path with G >= 2.
    out3 = jax.block_until_ready(concrete_strength_forward(x2, params))
    assert out3.shape == (b2, 1), out3.shape
    assert jnp.allclose(out3, ref2, atol=1e-2, rtol=1e-2), (
        f"max abs err {jnp.max(jnp.abs(out3 - ref2))}")

    print("KERNEL_OK")
</pallas_src>

<mosaic_0001>
module attributes {stable_mosaic.version = 11 : i64} {
  func.func @mlp_kernel(%arg0: i32, %arg1: memref<128x8xf32, #tpu.memory_space<vmem>>, %arg2: memref<64x8xf32, #tpu.memory_space<vmem>>, %arg3: memref<64x1xf32, #tpu.memory_space<vmem>>, %arg4: memref<32x64xbf16, #tpu.memory_space<vmem>>, %arg5: memref<32x1xf32, #tpu.memory_space<vmem>>, %arg6: memref<16x32xbf16, #tpu.memory_space<vmem>>, %arg7: memref<16x1xf32, #tpu.memory_space<vmem>>, %arg8: memref<16x1xf32, #tpu.memory_space<vmem>>, %arg9: memref<1x1xf32, #tpu.memory_space<vmem>>, %arg10: memref<1x1x128xf32, #tpu.memory_space<vmem>>) attributes {dimension_semantics = [#tpu.dimension_semantics<parallel>], iteration_bounds = array<i64: 1>, scalar_prefetch = 0 : i64, scratch_operands = 0 : i64, tpu.core_type = #tpu.core_type<tc>, window_params = [{transform_indices = @transform_0, window_bounds = array<i64: 128, 8>}, {pipeline_mode = #tpu.pipeline_mode<synchronous>, transform_indices = @transform_1, window_bounds = array<i64: 64, 8>}, {pipeline_mode = #tpu.pipeline_mode<synchronous>, transform_indices = @transform_2, window_bounds = array<i64: 64, 1>}, {pipeline_mode = #tpu.pipeline_mode<synchronous>, transform_indices = @transform_3, window_bounds = array<i64: 32, 64>}, {pipeline_mode = #tpu.pipeline_mode<synchronous>, transform_indices = @transform_4, window_bounds = array<i64: 32, 1>}, {pipeline_mode = #tpu.pipeline_mode<synchronous>, transform_indices = @transform_5, window_bounds = array<i64: 16, 32>}, {pipeline_mode = #tpu.pipeline_mode<synchronous>, transform_indices = @transform_6, window_bounds = array<i64: 16, 1>}, {pipeline_mode = #tpu.pipeline_mode<synchronous>, transform_indices = @transform_7, window_bounds = array<i64: 16, 1>}, {pipeline_mode = #tpu.pipeline_mode<synchronous>, transform_indices = @transform_8, window_bounds = array<i64: 1, 1>}, {transform_indices = @transform_9, window_bounds = array<i64: 1, 1, 128>}]} {
    %c0 = arith.constant 0 : index
    %c0_0 = arith.constant 0 : index
    %0 = vector.load %arg2[%c0, %c0_0] : memref<64x8xf32, #tpu.memory_space<vmem>>, vector<64x8xf32>
    %c0_1 = arith.constant 0 : index
    %c0_2 = arith.constant 0 : index
    %1 = vector.load %arg1[%c0_1, %c0_2] : memref<128x8xf32, #tpu.memory_space<vmem>>, vector<128x8xf32>
    %cst = arith.constant dense<0.000000e+00> : vector<64x128xf32>
    %2 = tpu.matmul %0, %1, %cst {dimension_numbers = #tpu.dot_dimension_numbers<[1], [1], [0], [0], [0, 0, 1, 0], [], []>} : vector<64x8xf32>, vector<128x8xf32>, vector<64x128xf32> -> vector<64x128xf32>
    %c0_3 = arith.constant 0 : index
    %c0_4 = arith.constant 0 : index
    %3 = vector.load %arg3[%c0_3, %c0_4] : memref<64x1xf32, #tpu.memory_space<vmem>>, vector<64x1xf32>
    %4 = vector.broadcast %3 : vector<64x1xf32> to vector<64x128xf32>
    %5 = arith.addf %2, %4 : vector<64x128xf32>
    %cst_5 = arith.constant 0.000000e+00 : f32
    %6 = vector.broadcast %cst_5 : f32 to vector<64x128xf32>
    %7 = arith.maximumf %5, %6 : vector<64x128xf32>
    %8 = arith.truncf %7 : vector<64x128xf32> to vector<64x128xbf16>
    %c0_6 = arith.constant 0 : index
    %c0_7 = arith.constant 0 : index
    %9 = vector.load %arg4[%c0_6, %c0_7] : memref<32x64xbf16, #tpu.memory_space<vmem>>, vector<32x64xbf16>
    %cst_8 = arith.constant dense<0.000000e+00> : vector<32x128xf32>
    %10 = tpu.matmul %9, %8, %cst_8 {dimension_numbers = #tpu.dot_dimension_numbers<[1], [0], [0], [1], [0, 0, 1, 1], [], []>} : vector<32x64xbf16>, vector<64x128xbf16>, vector<32x128xf32> -> vector<32x128xf32>
    %c0_9 = arith.constant 0 : index
    %c0_10 = arith.constant 0 : index
    %11 = vector.load %arg5[%c0_9, %c0_10] : memref<32x1xf32, #tpu.memory_space<vmem>>, vector<32x1xf32>
    %12 = vector.broadcast %11 : vector<32x1xf32> to vector<32x128xf32>
    %13 = arith.addf %10, %12 : vector<32x128xf32>
    %cst_11 = arith.constant 0.000000e+00 : f32
    %14 = vector.broadcast %cst_11 : f32 to vector<32x128xf32>
    %15 = arith.maximumf %13, %14 : vector<32x128xf32>
    %16 = arith.truncf %15 : vector<32x128xf32> to vector<32x128xbf16>
    %c0_12 = arith.constant 0 : index
    %c0_13 = arith.constant 0 : index
    %17 = vector.load %arg6[%c0_12, %c0_13] : memref<16x32xbf16, #tpu.memory_space<vmem>>, vector<16x32xbf16>
    %cst_14 = arith.constant dense<0.000000e+00> : vector<16x128xf32>
    %18 = tpu.matmul %17, %16, %cst_14 {dimension_numbers = #tpu.dot_dimension_numbers<[1], [0], [0], [1], [0, 0, 1, 1], [], []>} : vector<16x32xbf16>, vector<32x128xbf16>, vector<16x128xf32> -> vector<16x128xf32>
    %c0_15 = arith.constant 0 : index
    %c0_16 = arith.constant 0 : index
    %19 = vector.load %arg7[%c0_15, %c0_16] : memref<16x1xf32, #tpu.memory_space<vmem>>, vector<16x1xf32>
    %20 = vector.broadcast %19 : vector<16x1xf32> to vector<16x128xf32>
    %21 = arith.addf %18, %20 : vector<16x128xf32>
    %cst_17 = arith.constant 0.000000e+00 : f32
    %22 = vector.broadcast %cst_17 : f32 to vector<16x128xf32>
    %23 = arith.maximumf %21, %22 : vector<16x128xf32>
    %c0_18 = arith.constant 0 : index
    %c0_19 = arith.constant 0 : index
    %24 = vector.load %arg8[%c0_18, %c0_19] : memref<16x1xf32, #tpu.memory_space<vmem>>, vector<16x1xf32>
    %25 = vector.broadcast %24 : vector<16x1xf32> to vector<16x128xf32>
    %26 = arith.mulf %23, %25 : vector<16x128xf32>
    %cst_20 = arith.constant dense<0.000000e+00> : vector<128xf32>
    %27 = vector.multi_reduction <add>, %26, %cst_20 [0] : vector<16x128xf32> to vector<128xf32>
    %28 = vector.shape_cast %27 : vector<128xf32> to vector<1x128xf32>
    %c0_21 = arith.constant 0 : index
    %c0_22 = arith.constant 0 : index
    %29 = vector.load %arg9[%c0_21, %c0_22] : memref<1x1xf32, #tpu.memory_space<vmem>>, vector<1x1xf32>
    %30 = vector.broadcast %29 : vector<1x1xf32> to vector<1x128xf32>
    %31 = arith.addf %28, %30 : vector<1x128xf32>
    %32 = vector.shape_cast %31 : vector<1x128xf32> to vector<1x1x128xf32>
    %c0_23 = arith.constant 0 : index
    %c0_24 = arith.constant 0 : index
    %c0_25 = arith.constant 0 : index
    %33 = vector.load %arg10[%c0_23, %c0_24, %c0_25] : memref<1x1x128xf32, #tpu.memory_space<vmem>>, vector<1x1x128xf32>
    tpu.vector_store %arg10[%c0_23, %c0_24, %c0_25], %32 {strides = array<i32>} : memref<1x1x128xf32, #tpu.memory_space<vmem>>, vector<1x1x128xf32>,
    return
  }
  func.func @transform_0(%arg0: i32) -> (i32, i32) {
    %c0_i32 = arith.constant 0 : i32
    %c0_i32_0 = arith.constant 0 : i32
    return %arg0, %c0_i32 : i32, i32
  }
  func.func @transform_1(%arg0: i32) -> (i32, i32) {
    %c0_i32 = arith.constant 0 : i32
    %c0_i32_0 = arith.constant 0 : i32
    %c0_i32_1 = arith.constant 0 : i32
    return %c0_i32, %c0_i32_0 : i32, i32
  }
  func.func @transform_2(%arg0: i32) -> (i32, i32) {
    %c0_i32 = arith.constant 0 : i32
    %c0_i32_0 = arith.constant 0 : i32
    %c0_i32_1 = arith.constant 0 : i32
    return %c0_i32, %c0_i32_0 : i32, i32
  }
  func.func @transform_3(%arg0: i32) -> (i32, i32) {
    %c0_i32 = arith.constant 0 : i32
    %c0_i32_0 = arith.constant 0 : i32
    %c0_i32_1 = arith.constant 0 : i32
    return %c0_i32, %c0_i32_0 : i32, i32
  }
  func.func @transform_4(%arg0: i32) -> (i32, i32) {
    %c0_i32 = arith.constant 0 : i32
    %c0_i32_0 = arith.constant 0 : i32
    %c0_i32_1 = arith.constant 0 : i32
    return %c0_i32, %c0_i32_0 : i32, i32
  }
  func.func @transform_5(%arg0: i32) -> (i32, i32) {
    %c0_i32 = arith.constant 0 : i32
    %c0_i32_0 = arith.constant 0 : i32
    %c0_i32_1 = arith.constant 0 : i32
    return %c0_i32, %c0_i32_0 : i32, i32
  }
  func.func @transform_6(%arg0: i32) -> (i32, i32) {
    %c0_i32 = arith.constant 0 : i32
    %c0_i32_0 = arith.constant 0 : i32
    %c0_i32_1 = arith.constant 0 : i32
    return %c0_i32, %c0_i32_0 : i32, i32
  }
  func.func @transform_7(%arg0: i32) -> (i32, i32) {
    %c0_i32 = arith.constant 0 : i32
    %c0_i32_0 = arith.constant 0 : i32
    %c0_i32_1 = arith.constant 0 : i32
    return %c0_i32, %c0_i32_0 : i32, i32
  }
  func.func @transform_8(%arg0: i32) -> (i32, i32) {
    %c0_i32 = arith.constant 0 : i32
    %c0_i32_0 = arith.constant 0 : i32
    %c0_i32_1 = arith.constant 0 : i32
    return %c0_i32, %c0_i32_0 : i32, i32
  }
  func.func @transform_9(%arg0: i32) -> (i32, i32, i32) {
    %c0_i32 = arith.constant 0 : i32
    %c0_i32_0 = arith.constant 0 : i32
    %c0_i32_1 = arith.constant 0 : i32
    return %arg0, %c0_i32, %c0_i32_0 : i32, i32, i32
  }
}

</mosaic_0001>

<bundles_post_ra>
// kernel: concrete_strength_forward.1
= control target key start
LH: loop header
LB: loop body
LE: loop exit
PB: predicated region body
PF: predicated region fallthrough
CT: control target
= control target key end

     0   :  { %vm107_vm0 = vcmask 64512   ;;  %v683_v3 = vmov 0   ;;  %vm335_vm2 = vcmask 523264   ;;  %vm685_vm3 = vmmov 0   ;;  %s919_s0 = inlined_call_operand.vmem [shape: f32[128,8], index: 0, kind: input, shape index: {}]   ;;  %s920_s8 = inlined_call_operand.<no memory space> [shape: f32[1,1], index: 8, kind: input, shape index: {}]   ;;  %s921_s1 = inlined_call_operand.vmem [shape: f32[64,8], index: 1, kind: input, shape index: {}]   ;;  %s922_s2 = inlined_call_operand.vmem [shape: f32[64,1], index: 2, kind: input, shape index: {}]   ;;  %s923_s4 = inlined_call_operand.vmem [shape: f32[32,1], index: 4, kind: input, shape index: {}]   ;;  %s924_s6 = inlined_call_operand.vmem [shape: f32[16,1], index: 6, kind: input, shape index: {}]   ;;  %s925_s7 = inlined_call_operand.vmem [shape: f32[16,1], index: 7, kind: input, shape index: {}]   ;;  %s926_s3 = inlined_call_operand.vmem [shape: bf16[32,64], index: 3, kind: input, shape index: {}]   ;;  %s927_s5 = inlined_call_operand.vmem [shape: bf16[16,32], index: 5, kind: input, shape index: {}]   ;;  %s928_s9 = inlined_call_operand.vmem [shape: f32[1,1,128], index: 9, kind: output, shape index: {}]  }
   0x1   :  { %v43_v0 = vld [vmem:[%s919_s0] sm:$0xff]  ;;  %v44_v1 = vld [vmem:[%s919_s0 + $0x8] sm:$0xff]  ;;  %vm744_vm1 = vmpackc.low %vm107_vm0, %vm107_vm0  ;;  %678 = vset.pattern.permute.xlu0 %v683_v3  ;;  %679 = vset.pattern.permute.xlu1 %v683_v3  ;;  %v14_v4 = vstv %s920_s8  ;;  %vm416_vm4 = vcmask 261120  }
   0x2   :  { %v627_v5 = vpack.c.bf16 %v44_v1, %v43_v0  ;;  %v45_v6 = vld [vmem:[%s919_s0 + $0x10] sm:$0xff]  ;;  %v46_v7 = vld [vmem:[%s919_s0 + $0x18] sm:$0xff]  ;;  %15 = vst [vmem:[#allocation2] sm:$0x1] %v14_v4  ;;  %v35_v9 = vld [vmem:[%s921_s1] sm:$0xff] }
   0x3   :  { %v633_v8 = vpack.c.bf16 %v46_v7, %v45_v6  ;;  %v47_v10 = vld [vmem:[%s919_s0 + $0x20] sm:$0xff]  ;;  %v48_v11 = vld [vmem:[%s919_s0 + $0x28] sm:$0xff]  ;;  %595 = vmatprep.mubr.msk.f32.mxu0 %vm107_vm0, %v35_v9  ;;  %v61_v14 = vld [vmem:[%s922_s2 + $0x10] sm:$0xff] }
   0x4   :  { %629 = vmatprep.subr.msk.bf16.mxu0 %vm744_vm1, %v627_v5  ;;  %v59_v12 = vld [vmem:[%s922_s2] sm:$0xff]  ;;  %v639_v13 = vpack.c.bf16 %v48_v11, %v47_v10  ;;  %v60_v15 = vld [vmem:[%s922_s2 + $0x8] sm:$0xff]  ;;  %79 = vperm.xlu1 %679, %v61_v14   ;;  %v62_v16 = vld [vmem:[%s922_s2 + $0x18] sm:$0xff] }
   0x5   :  { %632 = vmatpush3.bf16.xpose.msk.msra.mxu0 %vm744_vm1, %v627_v5  ;;  %69 = vperm.xlu0 %678, %v59_v12   ;;  %v49_v17 = vld [vmem:[%s919_s0 + $0x30] sm:$0xff]  ;;  %v50_v18 = vld [vmem:[%s919_s0 + $0x38] sm:$0xff]  ;;  %v63_v19 = vld [vmem:[%s922_s2 + $0x20] sm:$0xff] }
   0x6   :  { %635 = vmatprep.subr.msk.bf16.mxu0 %vm744_vm1, %v633_v8  ;;  %v64_v20 = vld [vmem:[%s922_s2 + $0x28] sm:$0xff]  ;;  %v645_v21 = vpack.c.bf16 %v50_v18, %v49_v17  ;;  %v65_v22 = vld [vmem:[%s922_s2 + $0x30] sm:$0xff]  ;;  %v66_v23 = vld [vmem:[%s922_s2 + $0x38] sm:$0xff] }
   0x7   :  { %v51_v24 = vld [vmem:[%s919_s0 + $0x40] sm:$0xff]  ;;  %v52_v25 = vld [vmem:[%s919_s0 + $0x48] sm:$0xff]  ;;  %v303_v29 = vld [vmem:[%s923_s4 + $0x10] sm:$0xff] }
   0x8   :  { %84 = vperm.xlu1 %679, %v62_v16   ;;  %v301_v26 = vld [vmem:[%s923_s4] sm:$0xff]  ;;  %v302_v27 = vld [vmem:[%s923_s4 + $0x8] sm:$0xff]  ;;  %v651_v28 = vpack.c.bf16 %v52_v25, %v51_v24  ;;  %v304_v30 = vld [vmem:[%s923_s4 + $0x18] sm:$0xff] }
   0x9   :  { %74 = vperm.xlu0 %678, %v60_v15   ;;  %v53_v31 = vld [vmem:[%s919_s0 + $0x50] sm:$0xff]  ;;  %v54_v32 = vld [vmem:[%s919_s0 + $0x58] sm:$0xff]  ;;  %v399_v33 = vld [vmem:[%s924_s6] sm:$0xff] }
   0xa   :  { %v400_v34 = vld [vmem:[%s924_s6 + $0x8] sm:$0xff]  ;;  %v657_v35 = vpack.c.bf16 %v54_v32, %v53_v31  ;;  %v463_v36 = vld [vmem:[%s925_s7] sm:$0xff]  ;;  %v57_v42 = vld [vmem:[%s919_s0 + $0x70] sm:$0xff] }
   0xb   :  { %v464_v37 = vld [vmem:[%s925_s7 + $0x8] sm:$0xff]  ;;  %v55_v38 = vld [vmem:[%s919_s0 + $0x60] sm:$0xff]  ;;  %v58_v43 = vld [vmem:[%s919_s0 + $0x78] sm:$0xff] }
   0xc   :  { %94 = vperm.xlu1 %679, %v64_v20   ;;  %v56_v39 = vld [vmem:[%s919_s0 + $0x68] sm:$0xff]  ;;  %v484_v40 = vld [vmem:[#allocation2] sm:$0x1]  ;;  %v669_v44 = vpack.c.bf16 %v58_v43, %v57_v42  ;;  %v37_v46 = vld [vmem:[%s921_s1 + $0x10] sm:$0xff] }
   0xd   :  { %638 = vmatpush3.bf16.xpose.msk.msra.mxu0 %vm744_vm1, %v633_v8  ;;  %89 = vperm.xlu0 %678, %v63_v19   ;;  %v663_v41 = vpack.c.bf16 %v56_v39, %v55_v38  ;;  %v36_v45 = vld [vmem:[%s921_s1 + $0x8] sm:$0xff]  ;;  %v38_v47 = vld [vmem:[%s921_s1 + $0x18] sm:$0xff]  ;;  %v39_v48 = vld [vmem:[%s921_s1 + $0x20] sm:$0xff] }
   0xe   :  { %641 = vmatprep.subr.msk.bf16.mxu0 %vm744_vm1, %v639_v13  ;;  %v40_v49 = vld [vmem:[%s921_s1 + $0x28] sm:$0xff]  ;;  %v41_v50 = vld [vmem:[%s921_s1 + $0x30] sm:$0xff]  ;;  %v42_v51 = vld [vmem:[%s921_s1 + $0x38] sm:$0xff] }
   0xf   :  { %v680_v52 = vld [vmem:[%s926_s3] sm:$0xff]   ;;  %v681_v25 = vld [vmem:[%s926_s3 + $0x8] sm:$0xff]  }
  0x10   :  { %104 = vperm.xlu1 %679, %v66_v23   ;;  %615 = vmatprep.mubr.msk.bf16.mxu1 %vm335_vm2, %v680_v52 }
  0x11   :  { %99 = vperm.xlu0 %678, %v65_v22  }
  0x14   :  { %312 = vperm.xlu1 %679, %v302_v27  }
  0x15   :  { %644 = vmatpush3.bf16.xpose.msk.msra.mxu0 %vm744_vm1, %v639_v13  ;;  %307 = vperm.xlu0 %678, %v301_v26   ;;  %v684_v26 = vmov 0.0  }
  0x16   :  { %647 = vmatprep.subr.msk.bf16.mxu0 %vm744_vm1, %v645_v21 }
  0x18   :  { %322 = vperm.xlu1 %679, %v304_v30  }
  0x19   :  { %317 = vperm.xlu0 %678, %v303_v29  }
  0x1c   :  { %408 = vperm.xlu1 %679, %v400_v34  }
  0x1d   :  { %650 = vmatpush3.bf16.xpose.msk.msra.mxu0 %vm744_vm1, %v645_v21  ;;  %403 = vperm.xlu0 %678, %v399_v33  }
  0x1e   :  { %653 = vmatprep.subr.msk.bf16.mxu0 %vm744_vm1, %v651_v28 }
  0x20   :  { %472 = vperm.xlu1 %679, %v464_v37  }
  0x21   :  { %467 = vperm.xlu0 %678, %v463_v36  }
  0x25   :  { %656 = vmatpush3.bf16.xpose.msk.msra.mxu0 %vm744_vm1, %v651_v28  ;;  %487 = vperm.xlu0 %678, %v484_v40  }
  0x26   :  { %659 = vmatprep.subr.msk.bf16.mxu0 %vm744_vm1, %v657_v35 }
  0x2d   :  { %662 = vmatpush3.bf16.xpose.msk.msra.mxu0 %vm744_vm1, %v657_v35 }
  0x2e   :  { %665 = vmatprep.subr.msk.bf16.mxu0 %vm744_vm1, %v663_v41 }
  0x35   :  { %668 = vmatpush3.bf16.xpose.msk.msra.mxu0 %vm744_vm1, %v663_v41 }
  0x36   :  { %671 = vmatprep.subr.msk.bf16.mxu0 %vm744_vm1, %v669_v44 }
  0x3d   :  { %674 = vmatpush3.bf16.xpose.msk.msra.mxu0 %vm744_vm1, %v669_v44 }
  0x44   :  { %596 = vmatmul.mubr.msk.f32.vlgmr.msra.gmra.mrb[0].mxu0 %vm107_vm0, %v36_v45  ;;  %v682_v45 = vld [vmem:[%s927_s5] sm:$0xff]  }
  0x45   :  { %598 = vmatprep.mubr.msk.f32.mxu0 %vm107_vm0, %v37_v46 }
  0x48   :  { %599 = vmatmul.mubr.msk.f32.gmra.mrb[2].mxu0 %vm107_vm0, %v38_v47 }
  0x49   :  { %601 = vmatprep.mubr.msk.f32.mxu0 %vm107_vm0, %v39_v48 }
  0x4c   :  { %602 = vmatmul.mubr.msk.f32.gmra.mrb[4].mxu0 %vm107_vm0, %v40_v49 }
  0x4d   :  { %604 = vmatprep.mubr.msk.f32.mxu0 %vm107_vm0, %v41_v50 }
  0x50   :  { %605 = vmatmul.mubr.msk.f32.gmra.mrb[6].mxu0 %vm107_vm0, %v42_v51 }
  0x83   :  { %v80_v54 = vpop.permute.xlu1 %79 }
  0x84   :  { %v70_v53 = vpop.permute.xlu0 %69 }
  0x87   :  { %v85_v56 = vpop.permute.xlu1 %84 }
  0x88   :  { %v75_v55 = vpop.permute.xlu0 %74 }
  0x8b   :  { %v95_v2 = vpop.permute.xlu1 %94 }
  0x8c   :  { %v90_v5 = vpop.permute.xlu0 %89 }
  0x8f   :  { %v105_v14 = vpop.permute.xlu1 %104 }
  0x90   :  { %v100_v17 = vpop.permute.xlu0 %99 }
  0x93   :  { %v313_v28 = vpop.permute.xlu1 %312 }
  0x94   :  { %v308_v27 = vpop.permute.xlu0 %307 }
  0x97   :  { %v323_v33 = vpop.permute.xlu1 %322 }
  0x98   :  { %v318_v29 = vpop.permute.xlu0 %317 }
  0x9b   :  { %v409_v47 = vpop.permute.xlu1 %408 }
  0x9c   :  { %v404_v46 = vpop.permute.xlu0 %403 }
 0x117   :  { %v597_v57 = vpop.f32.mrb[0].mxu0 }
 0x118   :  { %v252_v58 = vadd.f32 %v597_v57, %v75_v55  ;;  %v246_v59 = vpop.f32.mrb[1].mxu0  ;;  %v473_v57 = vpop.permute.xlu1 %472 }
 0x119   :  { %v247_v60 = vadd.f32 %v246_v59, %v70_v53 }
 0x11a   :  { %v286_v61 = vmax.f32 %v252_v58, 0.0 }
 0x11b   :  { %v285_v62 = vmax.f32 %v247_v60, 0.0  ;;  %v600_v63 = vpop.f32.mrb[2].mxu0  ;;  %v490_v60 = vlaneseq }
 0x11c   :  { %v262_v0 = vadd.f32 %v600_v63, %v85_v56  ;;  %v256_v1 = vpop.f32.mrb[3].mxu0  ;;  %v468_v56 = vpop.permute.xlu0 %467 }
 0x11d   :  { %v257_v3 = vadd.f32 %v256_v1, %v80_v54  ;;  %v293_v4 = vpack.c.bf16 %v286_v61, %v285_v62  ;;  %v491_v63 = vshrl.u32 %v490_v60, 7 }
 0x11e   :  { %v288_v6 = vmax.f32 %v262_v0, 0.0 }
 0x11f   :  { %v287_v7 = vmax.f32 %v257_v3, 0.0  ;;  %v603_v8 = vpop.f32.mrb[4].mxu0  ;;  %607 = vmatprep.subr.bf16.mxu1 %v293_v4 }
 0x120   :  { %v272_v9 = vadd.f32 %v603_v8, %v95_v2  ;;  %v266_v10 = vpop.f32.mrb[5].mxu0  ;;  %608 = vmatpush3.bf16.msra.mxu1 %v293_v4  ;;  %v492_v2 = vsub.s32 0, %v491_v63  ;;  %v488_v4 = vpop.permute.xlu0 %487 }
 0x121   :  { %v294_v11 = vpack.c.bf16 %v288_v6, %v287_v7  ;;  %v267_v12 = vadd.f32 %v266_v10, %v90_v5 }
 0x122   :  { %v290_v13 = vmax.f32 %v272_v9, 0.0  ;;  %v493_v6 = vrot.slane %v488_v4, %v492_v2 }
 0x123   :  { %v289_v15 = vmax.f32 %v267_v12, 0.0  ;;  %v606_v16 = vpop.f32.mrb[6].mxu0  ;;  %609 = vmatprep.subr.bf16.mxu1 %v294_v11 }
 0x124   :  { %v282_v18 = vadd.f32 %v606_v16, %v105_v14  ;;  %v276_v19 = vpop.f32.mrb[7].mxu0  ;;  %610 = vmatpush3.bf16.msra.mxu1 %v294_v11 }
 0x125   :  { %v295_v20 = vpack.c.bf16 %v290_v13, %v289_v15  ;;  %v277_v21 = vadd.f32 %v276_v19, %v100_v17 }
 0x126   :  { %v292_v22 = vmax.f32 %v282_v18, 0.0 }
 0x127   :  { %v291_v23 = vmax.f32 %v277_v21, 0.0  ;;  %611 = vmatprep.subr.bf16.mxu1 %v295_v20 }
 0x128   :  { %612 = vmatpush3.bf16.msra.mxu1 %v295_v20 }
 0x129   :  { %v296_v24 = vpack.c.bf16 %v292_v22, %v291_v23 }
 0x12b   :  { %613 = vmatprep.subr.bf16.mxu1 %v296_v24 }
 0x12c   :  { %614 = vmatpush3.bf16.msra.mxu1 %v296_v24 }
 0x12d   :  { %619 = vmatprep.subr.bf16.mxu1 %v684_v26 }
 0x12f   :  { %616 = vmatmul.mubr.msk.bf16.vlgmr.msra.gmra.mrb[0].mxu1 %vm335_vm2, %v681_v25 }
 0x130   :  { %623 = vmatprep.mubr.msk.bf16.mxu1 %vm685_vm3, %v684_v26 }
 0x202   :  { %v617_v30 = vpop.f32.mrb[0].mxu1 }
 0x203   :  { %v385_v31 = vadd.f32 %v617_v30, %v318_v29  ;;  %v376_v32 = vpop.f32.mrb[1].mxu1 }
 0x204   :  { %v377_v34 = vadd.f32 %v376_v32, %v308_v27  ;;  %v618_v35 = vpop.f32.mrb[2].mxu1 }
 0x205   :  { %v388_v36 = vadd.f32 %v618_v35, %v323_v33  ;;  %v379_v37 = vpop.f32.mrb[3].mxu1  ;;  %v393_v39 = vmax.f32 %v385_v31, 0.0 }
 0x206   :  { %v380_v38 = vadd.f32 %v379_v37, %v313_v28  ;;  %v391_v41 = vmax.f32 %v377_v34, 0.0 }
 0x207   :  { %v394_v40 = vmax.f32 %v388_v36, 0.0 }
 0x208   :  { %v392_v42 = vmax.f32 %v380_v38, 0.0 }
 0x209   :  { %v396_v43 = vpack.c.bf16 %v394_v40, %v393_v39 }
 0x20a   :  { %v395_v44 = vpack.c.bf16 %v392_v42, %v391_v41 }
 0x20c   :  { %620 = vmatpush3.bf16.msra.mxu1 %v395_v44 }
 0x20d   :  { %621 = vmatprep.subr.bf16.mxu1 %v684_v26 }
 0x210   :  { %622 = vmatpush3.bf16.msra.mxu1 %v396_v43 }
 0x213   :  { %624 = vmatmul.mubr.msk.bf16.vlgmr.msra.gmra.mrb[4].mxu1 %vm416_vm4, %v682_v45 }
 0x2e6   :  { %v454_v48 = vpop.f32.mrb[4].mxu1 }
 0x2e7   :  { %v455_v49 = vadd.f32 %v454_v48, %v404_v46  ;;  %v625_v50 = vpop.f32.mrb[5].mxu1 }
 0x2e8   :  { %v457_v51 = vpop.f32.mrb[6].mxu1 }
 0x2e9   :  { %v461_v52 = vmax.f32 %v455_v49, 0.0  ;;  %v458_v53 = vadd.f32 %v457_v51, %v409_v47  ;;  %v626_v54 = vpop.f32.mrb[7].mxu1 }
 0x2eb   :  { %v462_v55 = vmax.f32 %v458_v53, 0.0  ;;  %v475_v58 = vmul.f32 %v468_v56, %v461_v52 }
 0x2ed   :  { %v476_v59 = vmul.f32 %v473_v57, %v462_v55 }
 0x2ef   :  { %v477_v61 = vadd.f32 %v476_v59, %v475_v58 }
 0x2f1   :  { %v478_v62 = vrot.slane %v477_v61, 4 }
 0x2f3   :  { %v479_v0 = vadd.f32 %v478_v62, %v477_v61 }
 0x2f5   :  { %v480_v1 = vrot.slane %v479_v0, 2 }
 0x2f7   :  { %v481_v3 = vadd.f32 %v480_v1, %v479_v0 }
 0x2f9   :  { %v482_v5 = vrot.slane %v481_v3, 1 }
 0x2fb   :  { %v483_v7 = vadd.f32 %v482_v5, %v481_v3 }
 0x2fd   :  { %v494_v8 = vadd.f32 %v493_v6, %v483_v7 }
 0x2ff   :  { %495 = vst [vmem:[%s928_s9] sm:$0x1] %v494_v8 }

</bundles_post_ra>
